<compile_context>
chip_gen: v7x
topology: tpu7x:2x2x1
jax: 0.10.0
libtpu: 0.0.40
codegen_flags: <defaults>
</compile_context>

<pallas_src>
import functools

import jax
import jax.numpy as jnp
from jax import lax
from jax.experimental import pallas as pl
from jax.experimental.pallas import tpu as pltpu


def _round_up(x, m):
    return (x + m - 1) // m * m


def _fused_embed_kernel(idx_ref, fused_ref, o_ref):
    # idx_ref:   (tm, 1)      int32   token ids for this tile (padded rows are 0)
    # fused_ref: (vocab, Hp)  bf16    fused table = emb_table @ W.T, H padded to 128 lanes
    # o_ref:     (tm, Hp)     f32     output tile
    idx = idx_ref[...]                                            # (tm, 1)
    tm = idx.shape[0]
    vocab = fused_ref.shape[0]

    # One-hot gather fused with the (pre-folded) projection:
    #   (tm, vocab) @ (vocab, Hp) -> (tm, Hp) on the MXU, f32 accumulation.
    col = lax.broadcasted_iota(jnp.int32, (tm, vocab), dimension=1)
    onehot = (col == idx).astype(fused_ref.dtype)                 # exact in bf16
    o_ref[...] = jnp.dot(
        onehot, fused_ref[...], preferred_element_type=jnp.float32
    ).astype(o_ref.dtype)


@functools.partial(jax.jit, static_argnames=("tm",))
def multi_layer_embedding(src, emb_table, linear_weight, *, tm=256):
    """src: (B, S) int ids; emb_table: (input_dim, layer1_dim);
    linear_weight: (hid_dim, layer1_dim) -- PyTorch nn.Linear layout."""
    B, S = src.shape
    N = B * S
    vocab, layer1_dim = emb_table.shape
    hid_dim = linear_weight.shape[0]

    # Fold the Linear into the table once per call:
    #   fused = emb_table @ W.T  via dot_general (contract dim 1 with dim 1),
    # so no transposed weight copy is materialized in HBM.
    fused = lax.dot_general(
        emb_table, linear_weight,
        dimension_numbers=(((1,), (1,)), ((), ())),
        preferred_element_type=jnp.float32)                       # (vocab, hid_dim)

    # Lane-dense output: pad hidden dim up to a multiple of 128.
    Hp = _round_up(hid_dim, 128)
    if Hp != hid_dim:
        fused = jnp.pad(fused, ((0, 0), (0, Hp - hid_dim)))
    fused = fused.astype(jnp.bfloat16)   # MXU bf16 throughput; halves VMEM footprint.

    # Pad token count up to a multiple of tm so no tokens are dropped.
    Np = _round_up(N, tm)
    idx = src.reshape(N).astype(jnp.int32)
    idx = jnp.pad(idx, (0, Np - N)).reshape(Np, 1)

    # VMEM budget: double-buffered idx/out tiles + (double-buffered) resident table.
    needed = 2 * (tm * 4 + tm * Hp * 4) + 2 * vocab * Hp * 2
    vmem_limit = int(min(96 * 2**20, max(32 * 2**20, 3 * needed)))

    out = pl.pallas_call(
        _fused_embed_kernel,
        out_shape=jax.ShapeDtypeStruct((Np, Hp), jnp.float32),
        grid_spec=pltpu.PrefetchScalarGridSpec(
            num_scalar_prefetch=0,
            grid=(Np // tm,),
            in_specs=[
                pl.BlockSpec((tm, 1), lambda i: (i, 0)),        # token-id tile
                pl.BlockSpec((vocab, Hp), lambda i: (0, 0)),    # fused table, grid-invariant
            ],
            out_specs=pl.BlockSpec((tm, Hp), lambda i: (i, 0)),
        ),
        compiler_params=pltpu.CompilerParams(
            dimension_semantics=("parallel",),
            vmem_limit_bytes=vmem_limit),
    )(idx, fused)

    return out[:N, :hid_dim].reshape(B, S, hid_dim)


if __name__ == "__main__":
    # Small shapes consistent with the module's forward: src (batch=2, seq=8).
    input_dim, layer1_dim, hid_dim = 16, 32, 32
    B, S = 2, 8

    key = jax.random.PRNGKey(0)
    k_src, k_tab, k_w = jax.random.split(key, 3)

    src = jax.random.randint(k_src, (B, S), 0, input_dim, dtype=jnp.int32)
    # Deterministic synthetic parameters (Embedding ~ N(0,1), Linear ~ U(-a,a)).
    emb_table = jax.random.normal(k_tab, (input_dim, layer1_dim), jnp.float32)
    bound = 1.0 / (layer1_dim ** 0.5)
    linear_weight = jax.random.uniform(
        k_w, (hid_dim, layer1_dim), jnp.float32, -bound, bound)

    out = multi_layer_embedding(src, emb_table, linear_weight)
    out = jax.block_until_ready(out)

    # Pure-JAX f32 reference (embedding gather + x @ W.T).  Kernel uses a bf16
    # fused table -> relax tolerance to bf16 rounding of the fused values.
    ref = jnp.take(emb_table, src, axis=0) @ linear_weight.T
    assert out.shape == (B, S, hid_dim)
    assert jnp.allclose(out, ref, atol=2e-2, rtol=2e-2), float(
        jnp.max(jnp.abs(out - ref)))

    print("KERNEL_OK")
</pallas_src>

<mosaic_0001>
module attributes {stable_mosaic.version = 11 : i64} {
  func.func @_fused_embed_kernel(%arg0: i32, %arg1: memref<256x1xi32, #tpu.memory_space<vmem>>, %arg2: memref<16x128xbf16, #tpu.memory_space<vmem>>, %arg3: memref<256x128xf32, #tpu.memory_space<vmem>>) attributes {dimension_semantics = [#tpu.dimension_semantics<parallel>], iteration_bounds = array<i64: 1>, scalar_prefetch = 0 : i64, scratch_operands = 0 : i64, tpu.core_type = #tpu.core_type<tc>, window_params = [{transform_indices = @transform_0, window_bounds = array<i64: 256, 1>}, {pipeline_mode = #tpu.pipeline_mode<synchronous>, transform_indices = @transform_1, window_bounds = array<i64: 16, 128>}, {transform_indices = @transform_2, window_bounds = array<i64: 256, 128>}]} {
    %c0 = arith.constant 0 : index
    %c0_0 = arith.constant 0 : index
    %0 = vector.load %arg1[%c0, %c0_0] : memref<256x1xi32, #tpu.memory_space<vmem>>, vector<256x1xi32>
    %1 = tpu.iota {dimensions = array<i32: 1>} : vector<256x16xi32>
    %2 = vector.broadcast %0 : vector<256x1xi32> to vector<256x16xi32>
    %3 = arith.cmpi eq, %1, %2 : vector<256x16xi32>
    %4 = arith.extui %3 : vector<256x16xi1> to vector<256x16xi32>
    %5 = arith.sitofp %4 : vector<256x16xi32> to vector<256x16xf32>
    %6 = arith.truncf %5 : vector<256x16xf32> to vector<256x16xbf16>
    %c0_1 = arith.constant 0 : index
    %c0_2 = arith.constant 0 : index
    %7 = vector.load %arg2[%c0_1, %c0_2] : memref<16x128xbf16, #tpu.memory_space<vmem>>, vector<16x128xbf16>
    %cst = arith.constant dense<0.000000e+00> : vector<256x128xf32>
    %8 = tpu.matmul %6, %7, %cst {dimension_numbers = #tpu.dot_dimension_numbers<[1], [0], [0], [1], [0, 0, 1, 1], [], []>} : vector<256x16xbf16>, vector<16x128xbf16>, vector<256x128xf32> -> vector<256x128xf32>
    %c0_3 = arith.constant 0 : index
    %c0_4 = arith.constant 0 : index
    %9 = vector.load %arg3[%c0_3, %c0_4] : memref<256x128xf32, #tpu.memory_space<vmem>>, vector<256x128xf32>
    tpu.vector_store %arg3[%c0_3, %c0_4], %8 {strides = array<i32>} : memref<256x128xf32, #tpu.memory_space<vmem>>, vector<256x128xf32>,
    return
  }
  func.func @transform_0(%arg0: i32) -> (i32, i32) {
    %c0_i32 = arith.constant 0 : i32
    %c0_i32_0 = arith.constant 0 : i32
    return %arg0, %c0_i32 : i32, i32
  }
  func.func @transform_1(%arg0: i32) -> (i32, i32) {
    %c0_i32 = arith.constant 0 : i32
    %c0_i32_0 = arith.constant 0 : i32
    %c0_i32_1 = arith.constant 0 : i32
    return %c0_i32, %c0_i32_0 : i32, i32
  }
  func.func @transform_2(%arg0: i32) -> (i32, i32) {
    %c0_i32 = arith.constant 0 : i32
    %c0_i32_0 = arith.constant 0 : i32
    return %arg0, %c0_i32 : i32, i32
  }
}

</mosaic_0001>

<bundles_post_ra>
// kernel: multi_layer_embedding.1
= control target key start
LH: loop header
LB: loop body
LE: loop exit
PB: predicated region body
PF: predicated region fallthrough
CT: control target
= control target key end

     0   :  { %v615_v0 = vmov 0   ;;  %v44_v34 = vlaneseq  ;;  %vm262_vm4 = vcmask 130048   ;;  %v616_v40 = vmov 0.0   ;;  %s909_s0 = inlined_call_operand.vmem [shape: s32[256,1], index: 0, kind: input, shape index: {}]   ;;  %s910_s1 = inlined_call_operand.vmem [shape: bf16[16,128], index: 1, kind: input, shape index: {}]   ;;  %s911_s2 = inlined_call_operand.vmem [shape: f32[256,128], index: 2, kind: output, shape index: {}]  }
   0x1   :  { %613 = vset.pattern.permute.xlu1 %v615_v0  ;;  %612 = vset.pattern.permute.xlu0 %v615_v0  ;;  %v28_v1 = vld [vmem:[%s909_s0 + $0x80] sm:$0xff]  ;;  %v29_v3 = vld [vmem:[%s909_s0 + $0x88] sm:$0xff]  ;;  %v15_v5 = vld [vmem:[%s909_s0 + $0x18] sm:$0xff] }
   0x2   :  { %v12_v2 = vld [vmem:[%s909_s0] sm:$0xff]  ;;  %95 = vperm.xlu1 %613, %v28_v1   ;;  %v13_v4 = vld [vmem:[%s909_s0 + $0x8] sm:$0xff]  ;;  %v14_v6 = vld [vmem:[%s909_s0 + $0x10] sm:$0xff]  ;;  %v731_v35 = vand.u32 127, %v44_v34 }
   0x3   :  { %47 = vperm.xlu0 %612, %v12_v2   ;;  %v31_v7 = vld [vmem:[%s909_s0 + $0x98] sm:$0xff]  ;;  %v30_v8 = vld [vmem:[%s909_s0 + $0x90] sm:$0xff]  ;;  %v614_v9 = vld [vmem:[%s910_s1] sm:$0xff]  }
   0x4   :  { %v17_v10 = vld [vmem:[%s909_s0 + $0x28] sm:$0xff]  ;;  %v16_v11 = vld [vmem:[%s909_s0 + $0x20] sm:$0xff]  ;;  %574 = vmatprep.subr.bf16.mxu0 %v614_v9  ;;  %608 = vmatprep.subr.bf16.mxu1 %v614_v9  ;;  %v19_v14 = vld [vmem:[%s909_s0 + $0x38] sm:$0xff] }
   0x5   :  { %575 = vmatpush3.bf16.msra.mxu0 %v614_v9  ;;  %609 = vmatpush3.bf16.msra.mxu1 %v614_v9  ;;  %v33_v12 = vld [vmem:[%s909_s0 + $0xa8] sm:$0xff]  ;;  %v32_v13 = vld [vmem:[%s909_s0 + $0xa0] sm:$0xff]  ;;  %v18_v15 = vld [vmem:[%s909_s0 + $0x30] sm:$0xff] }
   0x6   :  { %98 = vperm.xlu1 %613, %v29_v3   ;;  %v35_v16 = vld [vmem:[%s909_s0 + $0xb8] sm:$0xff]  ;;  %v34_v17 = vld [vmem:[%s909_s0 + $0xb0] sm:$0xff]  ;;  %v21_v18 = vld [vmem:[%s909_s0 + $0x48] sm:$0xff] }
   0x7   :  { %50 = vperm.xlu0 %612, %v13_v4   ;;  %v20_v19 = vld [vmem:[%s909_s0 + $0x40] sm:$0xff]  ;;  %v37_v20 = vld [vmem:[%s909_s0 + $0xc8] sm:$0xff]  ;;  %v23_v22 = vld [vmem:[%s909_s0 + $0x58] sm:$0xff] }
   0x8   :  { %v36_v21 = vld [vmem:[%s909_s0 + $0xc0] sm:$0xff]  ;;  %v22_v23 = vld [vmem:[%s909_s0 + $0x50] sm:$0xff]  ;;  %v39_v24 = vld [vmem:[%s909_s0 + $0xd8] sm:$0xff] }
   0x9   :  { %v38_v25 = vld [vmem:[%s909_s0 + $0xd0] sm:$0xff]  ;;  %v25_v26 = vld [vmem:[%s909_s0 + $0x68] sm:$0xff]  ;;  %v24_v27 = vld [vmem:[%s909_s0 + $0x60] sm:$0xff] }
   0xa   :  { %56 = vperm.xlu1 %613, %v15_v5   ;;  %v41_v28 = vld [vmem:[%s909_s0 + $0xe8] sm:$0xff]  ;;  %v40_v29 = vld [vmem:[%s909_s0 + $0xe0] sm:$0xff]  ;;  %v27_v30 = vld [vmem:[%s909_s0 + $0x78] sm:$0xff] }
   0xb   :  { %53 = vperm.xlu0 %612, %v14_v6   ;;  %v26_v31 = vld [vmem:[%s909_s0 + $0x70] sm:$0xff]  ;;  %v43_v32 = vld [vmem:[%s909_s0 + $0xf8] sm:$0xff] }
   0xc   :  { %v42_v33 = vld [vmem:[%s909_s0 + $0xf0] sm:$0xff] }
   0xe   :  { %104 = vperm.xlu1 %613, %v31_v7  }
   0xf   :  { %101 = vperm.xlu0 %612, %v30_v8  }
  0x12   :  { %62 = vperm.xlu1 %613, %v17_v10  }
  0x13   :  { %59 = vperm.xlu0 %612, %v16_v11  }
  0x16   :  { %110 = vperm.xlu1 %613, %v33_v12  }
  0x17   :  { %107 = vperm.xlu0 %612, %v32_v13  }
  0x1a   :  { %68 = vperm.xlu1 %613, %v19_v14  }
  0x1b   :  { %65 = vperm.xlu0 %612, %v18_v15  }
  0x1e   :  { %116 = vperm.xlu1 %613, %v35_v16  }
  0x1f   :  { %113 = vperm.xlu0 %612, %v34_v17  }
  0x22   :  { %74 = vperm.xlu1 %613, %v21_v18  }
  0x23   :  { %71 = vperm.xlu0 %612, %v20_v19  }
  0x26   :  { %122 = vperm.xlu1 %613, %v37_v20  }
  0x27   :  { %119 = vperm.xlu0 %612, %v36_v21  }
  0x2a   :  { %80 = vperm.xlu1 %613, %v23_v22  }
  0x2b   :  { %77 = vperm.xlu0 %612, %v22_v23  }
  0x2e   :  { %128 = vperm.xlu1 %613, %v39_v24  }
  0x2f   :  { %125 = vperm.xlu0 %612, %v38_v25  }
  0x32   :  { %86 = vperm.xlu1 %613, %v25_v26  }
  0x33   :  { %83 = vperm.xlu0 %612, %v24_v27  }
  0x36   :  { %134 = vperm.xlu1 %613, %v41_v28  }
  0x37   :  { %131 = vperm.xlu0 %612, %v40_v29  }
  0x3a   :  { %92 = vperm.xlu1 %613, %v27_v30  }
  0x3b   :  { %89 = vperm.xlu0 %612, %v26_v31  }
  0x3e   :  { %140 = vperm.xlu1 %613, %v43_v32  }
  0x3f   :  { %137 = vperm.xlu0 %612, %v42_v33  }
  0x81   :  { %v96_v36 = vpop.permute.xlu1 %95 }
  0x82   :  { %v48_v37 = vpop.permute.xlu0 %47  ;;  %vm158_vm0 = vcmp.eq.s32.totalorder %v731_v35, %v96_v36 }
  0x83   :  { %vm142_vm1 = vcmp.eq.s32.totalorder %v731_v35, %v48_v37  ;;  %v524_v41 = vsel %vm158_vm0, 1.0, %v616_v40 }
  0x84   :  { %v508_v42 = vsel %vm142_vm1, 1.0, %v616_v40 }
  0x85   :  { %v99_v38 = vpop.permute.xlu1 %98 }
  0x86   :  { %v51_v39 = vpop.permute.xlu0 %50  ;;  %vm159_vm2 = vcmp.eq.s32.totalorder %v731_v35, %v99_v38 }
  0x87   :  { %vm143_vm3 = vcmp.eq.s32.totalorder %v731_v35, %v51_v39  ;;  %v525_v43 = vsel %vm159_vm2, 1.0, %v616_v40 }
  0x88   :  { %v509_v44 = vsel %vm143_vm3, 1.0, %v616_v40  ;;  %v246_v46 = vpack.c.bf16 %v525_v43, %v524_v41 }
  0x89   :  { %v238_v45 = vpack.c.bf16 %v509_v44, %v508_v42  ;;  %v57_v47 = vpop.permute.xlu1 %56 }
  0x8a   :  { %v54_v48 = vpop.permute.xlu0 %53  ;;  %vm145_vm5 = vcmp.eq.s32.totalorder %v731_v35, %v57_v47  ;;  %592 = vmatprep.mubr.msk.bf16.mxu1 %vm262_vm4, %v246_v46 }
  0x8b   :  { %vm144_vm6 = vcmp.eq.s32.totalorder %v731_v35, %v54_v48  ;;  %576 = vmatprep.mubr.msk.bf16.mxu0 %vm262_vm4, %v238_v45  ;;  %v511_v49 = vsel %vm145_vm5, 1.0, %v616_v40 }
  0x8c   :  { %v510_v50 = vsel %vm144_vm6, 1.0, %v616_v40 }
  0x8d   :  { %v239_v51 = vpack.c.bf16 %v511_v49, %v510_v50  ;;  %v105_v52 = vpop.permute.xlu1 %104 }
  0x8e   :  { %v102_v53 = vpop.permute.xlu0 %101  ;;  %vm161_vm7 = vcmp.eq.s32.totalorder %v731_v35, %v105_v52 }
  0x8f   :  { %vm160_vm8 = vcmp.eq.s32.totalorder %v731_v35, %v102_v53  ;;  %577 = vmatmul.mubr.msk.bf16.vlgmr.msra.gmra.mrb[0].mxu0 %vm262_vm4, %v239_v51  ;;  %v527_v54 = vsel %vm161_vm7, 1.0, %v616_v40 }
  0x90   :  { %v526_v55 = vsel %vm160_vm8, 1.0, %v616_v40 }
  0x91   :  { %v247_v56 = vpack.c.bf16 %v527_v54, %v526_v55  ;;  %v63_v57 = vpop.permute.xlu1 %62 }
  0x92   :  { %v60_v58 = vpop.permute.xlu0 %59  ;;  %vm147_vm9 = vcmp.eq.s32.totalorder %v731_v35, %v63_v57 }
  0x93   :  { %vm146_vm10 = vcmp.eq.s32.totalorder %v731_v35, %v60_v58  ;;  %593 = vmatmul.mubr.msk.bf16.vlgmr.msra.gmra.mrb[0].mxu1 %vm262_vm4, %v247_v56  ;;  %v513_v59 = vsel %vm147_vm9, 1.0, %v616_v40 }
  0x94   :  { %v512_v60 = vsel %vm146_vm10, 1.0, %v616_v40 }
  0x95   :  { %v240_v61 = vpack.c.bf16 %v513_v59, %v512_v60  ;;  %v111_v62 = vpop.permute.xlu1 %110 }
  0x96   :  { %v108_v63 = vpop.permute.xlu0 %107  ;;  %vm163_vm11 = vcmp.eq.s32.totalorder %v731_v35, %v111_v62 }
  0x97   :  { %vm162_vm12 = vcmp.eq.s32.totalorder %v731_v35, %v108_v63  ;;  %580 = vmatprep.mubr.msk.bf16.mxu0 %vm262_vm4, %v240_v61  ;;  %v529_v0 = vsel %vm163_vm11, 1.0, %v616_v40 }
  0x98   :  { %v528_v1 = vsel %vm162_vm12, 1.0, %v616_v40 }
  0x99   :  { %v248_v2 = vpack.c.bf16 %v529_v0, %v528_v1  ;;  %v69_v3 = vpop.permute.xlu1 %68 }
  0x9a   :  { %v66_v4 = vpop.permute.xlu0 %65  ;;  %vm149_vm13 = vcmp.eq.s32.totalorder %v731_v35, %v69_v3 }
  0x9b   :  { %vm148_vm14 = vcmp.eq.s32.totalorder %v731_v35, %v66_v4  ;;  %596 = vmatprep.mubr.msk.bf16.mxu1 %vm262_vm4, %v248_v2  ;;  %v515_v5 = vsel %vm149_vm13, 1.0, %v616_v40 }
  0x9c   :  { %v514_v6 = vsel %vm148_vm14, 1.0, %v616_v40 }
  0x9d   :  { %v241_v7 = vpack.c.bf16 %v515_v5, %v514_v6  ;;  %v117_v8 = vpop.permute.xlu1 %116 }
  0x9e   :  { %v114_v9 = vpop.permute.xlu0 %113  ;;  %vm165_vm15 = vcmp.eq.s32.totalorder %v731_v35, %v117_v8 }
  0x9f   :  { %vm164_vm0 = vcmp.eq.s32.totalorder %v731_v35, %v114_v9  ;;  %581 = vmatmul.mubr.msk.bf16.gmra.mrb[4].mxu0 %vm262_vm4, %v241_v7  ;;  %v531_v10 = vsel %vm165_vm15, 1.0, %v616_v40 }
  0xa0   :  { %v530_v11 = vsel %vm164_vm0, 1.0, %v616_v40 }
  0xa1   :  { %v249_v12 = vpack.c.bf16 %v531_v10, %v530_v11  ;;  %v75_v13 = vpop.permute.xlu1 %74 }
  0xa2   :  { %v72_v14 = vpop.permute.xlu0 %71  ;;  %vm151_vm1 = vcmp.eq.s32.totalorder %v731_v35, %v75_v13 }
  0xa3   :  { %vm150_vm2 = vcmp.eq.s32.totalorder %v731_v35, %v72_v14  ;;  %597 = vmatmul.mubr.msk.bf16.gmra.mrb[4].mxu1 %vm262_vm4, %v249_v12  ;;  %v517_v15 = vsel %vm151_vm1, 1.0, %v616_v40 }
  0xa4   :  { %v516_v16 = vsel %vm150_vm2, 1.0, %v616_v40 }
  0xa5   :  { %v242_v17 = vpack.c.bf16 %v517_v15, %v516_v16  ;;  %v123_v18 = vpop.permute.xlu1 %122 }
  0xa6   :  { %v120_v19 = vpop.permute.xlu0 %119  ;;  %vm167_vm3 = vcmp.eq.s32.totalorder %v731_v35, %v123_v18 }
  0xa7   :  { %vm166_vm5 = vcmp.eq.s32.totalorder %v731_v35, %v120_v19  ;;  %584 = vmatprep.mubr.msk.bf16.mxu0 %vm262_vm4, %v242_v17  ;;  %v533_v20 = vsel %vm167_vm3, 1.0, %v616_v40 }
  0xa8   :  { %v532_v21 = vsel %vm166_vm5, 1.0, %v616_v40 }
  0xa9   :  { %v250_v22 = vpack.c.bf16 %v533_v20, %v532_v21  ;;  %v81_v23 = vpop.permute.xlu1 %80 }
  0xaa   :  { %v78_v24 = vpop.permute.xlu0 %77  ;;  %vm153_vm6 = vcmp.eq.s32.totalorder %v731_v35, %v81_v23 }
  0xab   :  { %vm152_vm7 = vcmp.eq.s32.totalorder %v731_v35, %v78_v24  ;;  %600 = vmatprep.mubr.msk.bf16.mxu1 %vm262_vm4, %v250_v22  ;;  %v519_v25 = vsel %vm153_vm6, 1.0, %v616_v40 }
  0xac   :  { %v518_v26 = vsel %vm152_vm7, 1.0, %v616_v40 }
  0xad   :  { %v243_v27 = vpack.c.bf16 %v519_v25, %v518_v26  ;;  %v129_v28 = vpop.permute.xlu1 %128 }
  0xae   :  { %v126_v29 = vpop.permute.xlu0 %125  ;;  %vm169_vm8 = vcmp.eq.s32.totalorder %v731_v35, %v129_v28 }
  0xaf   :  { %vm168_vm9 = vcmp.eq.s32.totalorder %v731_v35, %v126_v29  ;;  %585 = vmatmul.mubr.msk.bf16.gmra.mrb[8].mxu0 %vm262_vm4, %v243_v27  ;;  %v535_v30 = vsel %vm169_vm8, 1.0, %v616_v40 }
  0xb0   :  { %v534_v31 = vsel %vm168_vm9, 1.0, %v616_v40 }
  0xb1   :  { %v251_v32 = vpack.c.bf16 %v535_v30, %v534_v31  ;;  %v87_v33 = vpop.permute.xlu1 %86 }
  0xb2   :  { %v84_v34 = vpop.permute.xlu0 %83  ;;  %vm155_vm10 = vcmp.eq.s32.totalorder %v731_v35, %v87_v33 }
  0xb3   :  { %vm154_vm11 = vcmp.eq.s32.totalorder %v731_v35, %v84_v34  ;;  %601 = vmatmul.mubr.msk.bf16.gmra.mrb[8].mxu1 %vm262_vm4, %v251_v32  ;;  %v521_v36 = vsel %vm155_vm10, 1.0, %v616_v40 }
  0xb4   :  { %v520_v37 = vsel %vm154_vm11, 1.0, %v616_v40 }
  0xb5   :  { %v244_v38 = vpack.c.bf16 %v521_v36, %v520_v37  ;;  %v135_v39 = vpop.permute.xlu1 %134 }
  0xb6   :  { %v132_v41 = vpop.permute.xlu0 %131  ;;  %vm171_vm12 = vcmp.eq.s32.totalorder %v731_v35, %v135_v39 }
  0xb7   :  { %vm170_vm13 = vcmp.eq.s32.totalorder %v731_v35, %v132_v41  ;;  %588 = vmatprep.mubr.msk.bf16.mxu0 %vm262_vm4, %v244_v38  ;;  %v537_v42 = vsel %vm171_vm12, 1.0, %v616_v40 }
  0xb8   :  { %v536_v43 = vsel %vm170_vm13, 1.0, %v616_v40 }
  0xb9   :  { %v252_v44 = vpack.c.bf16 %v537_v42, %v536_v43  ;;  %v93_v45 = vpop.permute.xlu1 %92 }
  0xba   :  { %v90_v46 = vpop.permute.xlu0 %89  ;;  %vm157_vm14 = vcmp.eq.s32.totalorder %v731_v35, %v93_v45 }
  0xbb   :  { %vm156_vm15 = vcmp.eq.s32.totalorder %v731_v35, %v90_v46  ;;  %604 = vmatprep.mubr.msk.bf16.mxu1 %vm262_vm4, %v252_v44  ;;  %v523_v47 = vsel %vm157_vm14, 1.0, %v616_v40 }
  0xbc   :  { %v522_v48 = vsel %vm156_vm15, 1.0, %v616_v40 }
  0xbd   :  { %v245_v49 = vpack.c.bf16 %v523_v47, %v522_v48  ;;  %v141_v50 = vpop.permute.xlu1 %140 }
  0xbe   :  { %v138_v51 = vpop.permute.xlu0 %137  ;;  %vm173_vm0 = vcmp.eq.s32.totalorder %v731_v35, %v141_v50 }
  0xbf   :  { %vm172_vm1 = vcmp.eq.s32.totalorder %v731_v35, %v138_v51  ;;  %589 = vmatmul.mubr.msk.bf16.gmra.mrb[12].mxu0 %vm262_vm4, %v245_v49  ;;  %v539_v52 = vsel %vm173_vm0, 1.0, %v616_v40 }
  0xc0   :  { %v538_v53 = vsel %vm172_vm1, 1.0, %v616_v40 }
  0xc1   :  { %v253_v54 = vpack.c.bf16 %v539_v52, %v538_v53 }
  0xc3   :  { %605 = vmatmul.mubr.msk.bf16.gmra.mrb[12].mxu1 %vm262_vm4, %v253_v54 }
 0x162   :  { %v578_v55 = vpop.f32.mrb[0].mxu0 }
 0x163   :  { %474 = vst [vmem:[%s911_s2 + $0x10] sm:$0xff] %v578_v55  ;;  %v345_v56 = vpop.f32.mrb[1].mxu0 }
 0x164   :  { %472 = vst [vmem:[%s911_s2] sm:$0xff] %v345_v56  ;;  %v579_v35 = vpop.f32.mrb[2].mxu0 }
 0x165   :  { %475 = vst [vmem:[%s911_s2 + $0x18] sm:$0xff] %v579_v35  ;;  %v348_v57 = vpop.f32.mrb[3].mxu0 }
 0x166   :  { %473 = vst [vmem:[%s911_s2 + $0x8] sm:$0xff] %v348_v57  ;;  %v594_v40 = vpop.f32.mrb[0].mxu1 }
 0x167   :  { %490 = vst [vmem:[%s911_s2 + $0x90] sm:$0xff] %v594_v40  ;;  %v409_v58 = vpop.f32.mrb[1].mxu1 }
 0x168   :  { %488 = vst [vmem:[%s911_s2 + $0x80] sm:$0xff] %v409_v58  ;;  %v595_v59 = vpop.f32.mrb[2].mxu1 }
 0x169   :  { %491 = vst [vmem:[%s911_s2 + $0x98] sm:$0xff] %v595_v59  ;;  %v412_v60 = vpop.f32.mrb[3].mxu1 }
 0x16a   :  { %489 = vst [vmem:[%s911_s2 + $0x88] sm:$0xff] %v412_v60 }
 0x172   :  { %v582_v61 = vpop.f32.mrb[4].mxu0 }
 0x173   :  { %478 = vst [vmem:[%s911_s2 + $0x30] sm:$0xff] %v582_v61  ;;  %v361_v62 = vpop.f32.mrb[5].mxu0 }
 0x174   :  { %476 = vst [vmem:[%s911_s2 + $0x20] sm:$0xff] %v361_v62  ;;  %v583_v63 = vpop.f32.mrb[6].mxu0 }
 0x175   :  { %479 = vst [vmem:[%s911_s2 + $0x38] sm:$0xff] %v583_v63  ;;  %v364_v0 = vpop.f32.mrb[7].mxu0 }
 0x176   :  { %477 = vst [vmem:[%s911_s2 + $0x28] sm:$0xff] %v364_v0  ;;  %v598_v1 = vpop.f32.mrb[4].mxu1 }
 0x177   :  { %494 = vst [vmem:[%s911_s2 + $0xb0] sm:$0xff] %v598_v1  ;;  %v425_v2 = vpop.f32.mrb[5].mxu1 }
 0x178   :  { %492 = vst [vmem:[%s911_s2 + $0xa0] sm:$0xff] %v425_v2  ;;  %v599_v3 = vpop.f32.mrb[6].mxu1 }
 0x179   :  { %495 = vst [vmem:[%s911_s2 + $0xb8] sm:$0xff] %v599_v3  ;;  %v428_v4 = vpop.f32.mrb[7].mxu1 }
 0x17a   :  { %493 = vst [vmem:[%s911_s2 + $0xa8] sm:$0xff] %v428_v4 }
 0x182   :  { %v586_v5 = vpop.f32.mrb[8].mxu0 }
 0x183   :  { %482 = vst [vmem:[%s911_s2 + $0x50] sm:$0xff] %v586_v5  ;;  %v377_v6 = vpop.f32.mrb[9].mxu0 }
 0x184   :  { %480 = vst [vmem:[%s911_s2 + $0x40] sm:$0xff] %v377_v6  ;;  %v587_v7 = vpop.f32.mrb[10].mxu0 }
 0x185   :  { %483 = vst [vmem:[%s911_s2 + $0x58] sm:$0xff] %v587_v7  ;;  %v380_v8 = vpop.f32.mrb[11].mxu0 }
 0x186   :  { %481 = vst [vmem:[%s911_s2 + $0x48] sm:$0xff] %v380_v8  ;;  %v602_v9 = vpop.f32.mrb[8].mxu1 }
 0x187   :  { %498 = vst [vmem:[%s911_s2 + $0xd0] sm:$0xff] %v602_v9  ;;  %v441_v10 = vpop.f32.mrb[9].mxu1 }
 0x188   :  { %496 = vst [vmem:[%s911_s2 + $0xc0] sm:$0xff] %v441_v10  ;;  %v603_v11 = vpop.f32.mrb[10].mxu1 }
 0x189   :  { %499 = vst [vmem:[%s911_s2 + $0xd8] sm:$0xff] %v603_v11  ;;  %v444_v12 = vpop.f32.mrb[11].mxu1 }
 0x18a   :  { %497 = vst [vmem:[%s911_s2 + $0xc8] sm:$0xff] %v444_v12 }
 0x192   :  { %v590_v13 = vpop.f32.mrb[12].mxu0 }
 0x193   :  { %486 = vst [vmem:[%s911_s2 + $0x70] sm:$0xff] %v590_v13  ;;  %v393_v14 = vpop.f32.mrb[13].mxu0 }
 0x194   :  { %484 = vst [vmem:[%s911_s2 + $0x60] sm:$0xff] %v393_v14  ;;  %v591_v15 = vpop.f32.mrb[14].mxu0 }
 0x195   :  { %487 = vst [vmem:[%s911_s2 + $0x78] sm:$0xff] %v591_v15  ;;  %v396_v16 = vpop.f32.mrb[15].mxu0 }
 0x196   :  { %485 = vst [vmem:[%s911_s2 + $0x68] sm:$0xff] %v396_v16  ;;  %v606_v17 = vpop.f32.mrb[12].mxu1 }
 0x197   :  { %502 = vst [vmem:[%s911_s2 + $0xf0] sm:$0xff] %v606_v17  ;;  %v457_v18 = vpop.f32.mrb[13].mxu1 }
 0x198   :  { %500 = vst [vmem:[%s911_s2 + $0xe0] sm:$0xff] %v457_v18  ;;  %v607_v19 = vpop.f32.mrb[14].mxu1 }
 0x199   :  { %503 = vst [vmem:[%s911_s2 + $0xf8] sm:$0xff] %v607_v19  ;;  %v460_v20 = vpop.f32.mrb[15].mxu1 }
 0x19a   :  { %501 = vst [vmem:[%s911_s2 + $0xe8] sm:$0xff] %v460_v20 }

</bundles_post_ra>
